<compile_context>
chip_gen: v7x
topology: tpu7x:2x2x1
jax: 0.10.0
libtpu: 0.0.40
codegen_flags: <defaults>
</compile_context>

<pallas_src>
import functools

import jax
import jax.numpy as jnp
from jax.experimental import pallas as pl
from jax.experimental.pallas import tpu as pltpu


def _round_up(x: int, m: int) -> int:
    return ((x + m - 1) // m) * m


def _vmem_budget_bytes() -> int:
    """Generation-aware scoped-VMEM budget: capacity minus ~15% headroom."""
    cap = 64 * 1024 * 1024                       # conservative fallback (v7x per-TC)
    try:
        cap = int(getattr(pltpu.get_tpu_info(), "vmem_capacity_bytes", cap))
    except Exception:                            # not on TPU / interpret mode
        pass
    return int(cap * 0.85)                       # room for Mosaic scratch / temporaries


def _row_tiling(M: int, tm_target: int, row_align: int):
    """Pack-aligned row tile, padded row count and grid length (>=2 steps if possible)."""
    half = _round_up(pl.cdiv(M, 2), row_align)
    tm = max(row_align, min(_round_up(tm_target, row_align), half))
    Mp = _round_up(M, tm)
    gm = Mp // tm
    # v7x megacore: prefer an even number of row tiles so both TCs get equal shards.
    if gm > 2 and gm % 2 == 1:
        tm_alt = max(row_align, _round_up(pl.cdiv(M, gm + 1), row_align))
        Mp_alt = _round_up(M, tm_alt)
        if (Mp_alt // tm_alt) % 2 == 0:
            tm, Mp, gm = tm_alt, Mp_alt, Mp_alt // tm_alt
    return tm, Mp, gm


def _silu(h, approx: bool):
    # SiLU in f32.  bf16 MXU path: exp + approx vrcp both land on the EUP slot
    # (frees VALU, ~halves EUP work); f32 path keeps the exact sigmoid.
    if approx:
        return h * pl.reciprocal(1.0 + jnp.exp(-h), approx=True)
    return h * jax.nn.sigmoid(h)


def _ffn_kernel_full(x_ref, w1_ref, b1_ref, w2_ref, b2_ref, o_ref, *, approx_silu):
    # x:(tm,Dp)  w1:(Dp,Hp)  b1:(1,Hp) f32  w2:(Hp,Dp)  b2:(1,Dp) f32  o:(tm,Dp)
    x = x_ref[...].astype(w1_ref.dtype)          # MXU cast folded into the kernel
    h = jnp.dot(x, w1_ref[...], preferred_element_type=jnp.float32) + b1_ref[...]
    h = _silu(h, approx_silu)                    # dropout1: identity (eval mode)
    y = jnp.dot(h.astype(w2_ref.dtype), w2_ref[...],
                preferred_element_type=jnp.float32) + b2_ref[...]
    o_ref[...] = y.astype(o_ref.dtype)           # dropout2: identity (eval mode)


def _ffn_kernel_htiled(x_ref, w1_ref, b1_ref, w2_ref, b2_ref, o_ref, acc_ref, *,
                       approx_silu):
    # Grid (row tiles, H tiles): y = sum_h silu(x @ w1_h + b1_h) @ w2_h  (+ b2 at end).
    h_idx = pl.program_id(1)

    @pl.when(h_idx == 0)
    def _():
        acc_ref[...] = jnp.zeros_like(acc_ref)

    x = x_ref[...].astype(w1_ref.dtype)
    hblk = jnp.dot(x, w1_ref[...], preferred_element_type=jnp.float32) + b1_ref[...]
    hblk = _silu(hblk, approx_silu)              # dropout1: identity (eval mode)
    acc_ref[...] += jnp.dot(hblk.astype(w2_ref.dtype), w2_ref[...],
                            preferred_element_type=jnp.float32)

    @pl.when(h_idx == pl.num_programs(1) - 1)
    def _():
        o_ref[...] = (acc_ref[...] + b2_ref[...]).astype(o_ref.dtype)


def _full_vmem(tm, Dp, Hp, xbytes, wbytes, obytes):
    return ((Dp * Hp + Hp * Dp) * wbytes         # resident weights (single buffer)
            + (Hp + Dp) * 4                      # resident f32 biases
            + 2 * tm * Dp * (xbytes + obytes)    # double-buffered x / out tiles
            + tm * Hp * 4                        # f32 hidden intermediate
            + tm * (Hp + Dp) * wbytes)           # cast copies feeding the MXU


def _htiled_vmem(tm, th, Dp, xbytes, wbytes, obytes):
    return (2 * (Dp * th + th * Dp) * wbytes     # double-buffered weight tiles
            + 2 * th * 4 + Dp * 4                # b1 tiles + resident b2
            + 2 * tm * Dp * (xbytes + obytes)    # double-buffered x / out tiles
            + tm * Dp * 4                        # f32 accumulator scratch
            + tm * th * 4                        # f32 hidden tile
            + tm * (th + Dp) * wbytes)           # cast copies feeding the MXU


def feedforward(x, w1, b1, w2, b2, *, tm=512, th=512, compute_dtype=None,
                force_h_tiled=False):
    """Fused eval-mode FeedForward: silu(x @ w1 + b1) @ w2 + b2.

    x: (B, S, D); w1: (D, H); b1: (H,); w2: (H, D); b2: (D,).
    compute_dtype sets the MXU operand dtype (default: bfloat16 for float32
    inputs); accumulation, bias adds and SiLU are always f32.
    """
    B, S, D = x.shape
    H = w1.shape[1]
    M = B * S
    out_dtype = x.dtype
    xbytes = jnp.dtype(x.dtype).itemsize
    obytes = jnp.dtype(out_dtype).itemsize

    if compute_dtype is None:
        mxu_dtype = (jnp.dtype(jnp.bfloat16)
                     if jnp.dtype(x.dtype) == jnp.dtype(jnp.float32)
                     else jnp.dtype(x.dtype))
    else:
        mxu_dtype = jnp.dtype(compute_dtype)
    wbytes = mxu_dtype.itemsize
    approx_silu = mxu_dtype != jnp.dtype(jnp.float32)

    Dp = _round_up(D, 128)
    Hp = _round_up(H, 128)

    row_align = 8 if xbytes >= 4 else (16 if xbytes == 2 else 32)
    tm_eff, Mp, grid_m = _row_tiling(M, tm, row_align)

    budget = _vmem_budget_bytes()
    use_htiled = (force_h_tiled
                  or _full_vmem(tm_eff, Dp, Hp, xbytes, wbytes, obytes) > budget)

    if use_htiled:
        th_eff = min(_round_up(min(th, Hp), 128), Hp)
        Hp = _round_up(H, th_eff)
        grid_h = Hp // th_eff
        for _ in range(6):   # shrink row tile until the working set fits the budget
            if (_htiled_vmem(tm_eff, th_eff, Dp, xbytes, wbytes, obytes) <= budget
                    or tm_eff <= row_align):
                break
            tm_eff, Mp, grid_m = _row_tiling(M, max(row_align, tm_eff // 2), row_align)
        vmem_needed = _htiled_vmem(tm_eff, th_eff, Dp, xbytes, wbytes, obytes)
    else:
        vmem_needed = _full_vmem(tm_eff, Dp, Hp, xbytes, wbytes, obytes)

    vmem_limit = int(min(budget, max(2 * vmem_needed, 32 * 1024 * 1024)))

    # Pad / cast only when needed (fast path: no wrapper-side HBM passes for
    # aligned shapes).  x keeps its dtype; the MXU cast happens in the kernel.
    def prep(a, rows, cols, dtype):
        if a.dtype != dtype:
            a = a.astype(dtype)
        pr, pc = rows - a.shape[0], cols - a.shape[1]
        if pr or pc:
            a = jnp.pad(a, ((0, pr), (0, pc)))
        return a

    x2 = prep(x.reshape(M, D), Mp, Dp, x.dtype)
    w1p = prep(w1, Dp, Hp, mxu_dtype)
    w2p = prep(w2, Hp, Dp, mxu_dtype)
    b1p = prep(b1.reshape(1, H), 1, Hp, jnp.float32)
    b2p = prep(b2.reshape(1, D), 1, Dp, jnp.float32)

    if use_htiled:
        kernel = functools.partial(_ffn_kernel_htiled, approx_silu=approx_silu)
        grid = (grid_m, grid_h)
        in_specs = [
            pl.BlockSpec((tm_eff, Dp), lambda i, h: (i, 0)),      # x row tile
            pl.BlockSpec((Dp, th_eff), lambda i, h: (0, h)),      # w1 H-tile
            pl.BlockSpec((1, th_eff), lambda i, h: (0, h)),       # b1 H-tile (f32)
            pl.BlockSpec((th_eff, Dp), lambda i, h: (h, 0)),      # w2 H-tile
            pl.BlockSpec((1, Dp), lambda i, h: (0, 0),
                         pipeline_mode=pl.Buffered(1)),           # b2 resident
        ]
        out_specs = pl.BlockSpec((tm_eff, Dp), lambda i, h: (i, 0))
        scratch = [pltpu.VMEM((tm_eff, Dp), jnp.float32)]         # f32 accumulator
        dims = ("parallel", "arbitrary")
        weight_passes = grid_m
    else:
        kernel = functools.partial(_ffn_kernel_full, approx_silu=approx_silu)
        grid = (grid_m,)
        resident = dict(pipeline_mode=pl.Buffered(1))             # fetched once, 1 buffer
        in_specs = [
            pl.BlockSpec((tm_eff, Dp), lambda i: (i, 0)),         # x row tile
            pl.BlockSpec((Dp, Hp), lambda i: (0, 0), **resident),  # w1 (resident)
            pl.BlockSpec((1, Hp), lambda i: (0, 0), **resident),   # b1 (f32)
            pl.BlockSpec((Hp, Dp), lambda i: (0, 0), **resident),  # w2 (resident)
            pl.BlockSpec((1, Dp), lambda i: (0, 0), **resident),   # b2 (f32)
        ]
        out_specs = pl.BlockSpec((tm_eff, Dp), lambda i: (i, 0))
        scratch = []
        dims = ("parallel",)
        weight_passes = 1

    cost = pl.CostEstimate(
        flops=4 * Mp * Dp * Hp,                  # two (Mp, Dp, Hp) matmuls
        transcendentals=Mp * Hp,                 # sigmoid/exp in SiLU
        bytes_accessed=(Mp * Dp * (xbytes + obytes)
                        + weight_passes * (2 * Dp * Hp) * wbytes
                        + (Hp + Dp) * 4),
    )

    out = pl.pallas_call(
        kernel,
        out_shape=jax.ShapeDtypeStruct((Mp, Dp), out_dtype),
        grid_spec=pltpu.PrefetchScalarGridSpec(
            num_scalar_prefetch=0,
            grid=grid,
            in_specs=in_specs,
            out_specs=out_specs,
            scratch_shapes=scratch,
        ),
        compiler_params=pltpu.CompilerParams(
            dimension_semantics=dims,
            vmem_limit_bytes=vmem_limit,
        ),
        cost_estimate=cost,
    )(x2, w1p, b1p, w2p, b2p)

    if (Mp, Dp) != (M, D):
        out = out[:M, :D]
    return out.reshape(B, S, D)


def _ref_ffn(x, w1, b1, w2, b2):
    # Near-exact f32 reference (HIGHEST precision matmuls).
    h = jnp.einsum("bsd,dh->bsh", x, w1, precision=jax.lax.Precision.HIGHEST) + b1
    h = h * jax.nn.sigmoid(h)
    return jnp.einsum("bsh,hd->bsd", h, w2, precision=jax.lax.Precision.HIGHEST) + b2


if __name__ == "__main__":
    key = jax.random.PRNGKey(0)

    # FeedForward(input_dim=32, expansion_factor=8): as written in the module,
    # linear1 maps input_dim -> expansion_factor, so hidden width == 8.
    B, S, D, Hdim = 2, 8, 32, 8
    kx, k1, k2, k3, k4, k5 = jax.random.split(key, 6)
    x = jax.random.normal(kx, (B, S, D), jnp.float32)
    # PyTorch Linear params are (out, in); pre-transposed to (in, out).
    w1 = (jax.random.normal(k1, (Hdim, D), jnp.float32) * 0.1).T    # (D, H)
    b1 = jax.random.normal(k2, (Hdim,), jnp.float32) * 0.1
    w2 = (jax.random.normal(k3, (D, Hdim), jnp.float32) * 0.1).T    # (H, D)
    b2 = jax.random.normal(k4, (D,), jnp.float32) * 0.1
    y_ref = _ref_ffn(x, w1, b1, w2, b2)

    # 1) f32 MXU path (full-H kernel, resident single-buffered weights): tight match.
    y = feedforward(x, w1, b1, w2, b2, compute_dtype=jnp.float32)
    jax.block_until_ready(y)
    assert y.shape == y_ref.shape
    assert jnp.allclose(y, y_ref, atol=1e-5, rtol=1e-5)

    # 2) Default path: bf16 MXU operands, f32 accumulation (the v5e/v6e/v7x
    #    throughput path); loose tolerance due to bf16 operand rounding.
    y_bf16 = feedforward(x, w1, b1, w2, b2)
    jax.block_until_ready(y_bf16)
    assert jnp.allclose(y_bf16, y_ref, atol=5e-2, rtol=5e-2)

    # 3) H-tiled accumulator kernel (the v7x large-width fallback), forced at a
    #    small multi-tile shape so the accumulate / finalize path is exercised.
    D2, H2 = 256, 384
    xb = jax.random.normal(k5, (B, S, D2), jnp.float32)
    w1b = jax.random.normal(k1, (D2, H2), jnp.float32) * 0.05
    b1b = jax.random.normal(k2, (H2,), jnp.float32) * 0.05
    w2b = jax.random.normal(k3, (H2, D2), jnp.float32) * 0.05
    b2b = jax.random.normal(k4, (D2,), jnp.float32) * 0.05
    y2_ref = _ref_ffn(xb, w1b, b1b, w2b, b2b)
    y2 = feedforward(xb, w1b, b1b, w2b, b2b, th=128, compute_dtype=jnp.float32,
                     force_h_tiled=True)
    jax.block_until_ready(y2)
    assert jnp.allclose(y2, y2_ref, atol=1e-4, rtol=1e-4)

    print("KERNEL_OK")
</pallas_src>

<mosaic_0001>
module attributes {stable_mosaic.version = 11 : i64} {
  func.func @_ffn_kernel_full(%arg0: i32, %arg1: memref<8x128xf32, #tpu.memory_space<vmem>>, %arg2: memref<128x128xf32, #tpu.memory_space<vmem>>, %arg3: memref<1x128xf32, #tpu.memory_space<vmem>>, %arg4: memref<128x128xf32, #tpu.memory_space<vmem>>, %arg5: memref<1x128xf32, #tpu.memory_space<vmem>>, %arg6: memref<8x128xf32, #tpu.memory_space<vmem>>) attributes {dimension_semantics = [#tpu.dimension_semantics<parallel>], iteration_bounds = array<i64: 2>, scalar_prefetch = 0 : i64, scratch_operands = 0 : i64, tpu.core_type = #tpu.core_type<tc>, window_params = [{transform_indices = @transform_0, window_bounds = array<i64: 8, 128>}, {pipeline_mode = #tpu.pipeline_mode<synchronous>, transform_indices = @transform_1, window_bounds = array<i64: 128, 128>}, {pipeline_mode = #tpu.pipeline_mode<synchronous>, transform_indices = @transform_2, window_bounds = array<i64: 1, 128>}, {pipeline_mode = #tpu.pipeline_mode<synchronous>, transform_indices = @transform_3, window_bounds = array<i64: 128, 128>}, {pipeline_mode = #tpu.pipeline_mode<synchronous>, transform_indices = @transform_4, window_bounds = array<i64: 1, 128>}, {transform_indices = @transform_5, window_bounds = array<i64: 8, 128>}]} {
    %c0 = arith.constant 0 : index
    %c0_0 = arith.constant 0 : index
    %0 = vector.load %arg1[%c0, %c0_0] : memref<8x128xf32, #tpu.memory_space<vmem>>, vector<8x128xf32>
    %c0_1 = arith.constant 0 : index
    %c0_2 = arith.constant 0 : index
    %1 = vector.load %arg2[%c0_1, %c0_2] : memref<128x128xf32, #tpu.memory_space<vmem>>, vector<128x128xf32>
    %cst = arith.constant dense<0.000000e+00> : vector<8x128xf32>
    %2 = tpu.matmul %0, %1, %cst {dimension_numbers = #tpu.dot_dimension_numbers<[1], [0], [0], [1], [0, 0, 1, 1], [], []>} : vector<8x128xf32>, vector<128x128xf32>, vector<8x128xf32> -> vector<8x128xf32>
    %c0_3 = arith.constant 0 : index
    %c0_4 = arith.constant 0 : index
    %3 = vector.load %arg3[%c0_3, %c0_4] : memref<1x128xf32, #tpu.memory_space<vmem>>, vector<1x128xf32>
    %4 = vector.broadcast %3 : vector<1x128xf32> to vector<8x128xf32>
    %5 = arith.addf %2, %4 : vector<8x128xf32>
    %6 = arith.negf %5 : vector<8x128xf32>
    %7 = math.exp %6 : vector<8x128xf32>
    %cst_5 = arith.constant 1.000000e+00 : f32
    %8 = vector.broadcast %cst_5 : f32 to vector<8x128xf32>
    %9 = arith.addf %8, %7 : vector<8x128xf32>
    %10 = arith.divf %8, %9 : vector<8x128xf32>
    %11 = arith.mulf %5, %10 : vector<8x128xf32>
    %c0_6 = arith.constant 0 : index
    %c0_7 = arith.constant 0 : index
    %12 = vector.load %arg4[%c0_6, %c0_7] : memref<128x128xf32, #tpu.memory_space<vmem>>, vector<128x128xf32>
    %cst_8 = arith.constant dense<0.000000e+00> : vector<8x128xf32>
    %13 = tpu.matmul %11, %12, %cst_8 {dimension_numbers = #tpu.dot_dimension_numbers<[1], [0], [0], [1], [0, 0, 1, 1], [], []>} : vector<8x128xf32>, vector<128x128xf32>, vector<8x128xf32> -> vector<8x128xf32>
    %c0_9 = arith.constant 0 : index
    %c0_10 = arith.constant 0 : index
    %14 = vector.load %arg5[%c0_9, %c0_10] : memref<1x128xf32, #tpu.memory_space<vmem>>, vector<1x128xf32>
    %15 = vector.broadcast %14 : vector<1x128xf32> to vector<8x128xf32>
    %16 = arith.addf %13, %15 : vector<8x128xf32>
    %c0_11 = arith.constant 0 : index
    %c0_12 = arith.constant 0 : index
    %17 = vector.load %arg6[%c0_11, %c0_12] : memref<8x128xf32, #tpu.memory_space<vmem>>, vector<8x128xf32>
    tpu.vector_store %arg6[%c0_11, %c0_12], %16 {strides = array<i32>} : memref<8x128xf32, #tpu.memory_space<vmem>>, vector<8x128xf32>,
    return
  }
  func.func @transform_0(%arg0: i32) -> (i32, i32) {
    %c0_i32 = arith.constant 0 : i32
    %c0_i32_0 = arith.constant 0 : i32
    return %arg0, %c0_i32 : i32, i32
  }
  func.func @transform_1(%arg0: i32) -> (i32, i32) {
    %c0_i32 = arith.constant 0 : i32
    %c0_i32_0 = arith.constant 0 : i32
    %c0_i32_1 = arith.constant 0 : i32
    return %c0_i32, %c0_i32_0 : i32, i32
  }
  func.func @transform_2(%arg0: i32) -> (i32, i32) {
    %c0_i32 = arith.constant 0 : i32
    %c0_i32_0 = arith.constant 0 : i32
    %c0_i32_1 = arith.constant 0 : i32
    return %c0_i32, %c0_i32_0 : i32, i32
  }
  func.func @transform_3(%arg0: i32) -> (i32, i32) {
    %c0_i32 = arith.constant 0 : i32
    %c0_i32_0 = arith.constant 0 : i32
    %c0_i32_1 = arith.constant 0 : i32
    return %c0_i32, %c0_i32_0 : i32, i32
  }
  func.func @transform_4(%arg0: i32) -> (i32, i32) {
    %c0_i32 = arith.constant 0 : i32
    %c0_i32_0 = arith.constant 0 : i32
    %c0_i32_1 = arith.constant 0 : i32
    return %c0_i32, %c0_i32_0 : i32, i32
  }
  func.func @transform_5(%arg0: i32) -> (i32, i32) {
    %c0_i32 = arith.constant 0 : i32
    %c0_i32_0 = arith.constant 0 : i32
    return %arg0, %c0_i32 : i32, i32
  }
}

</mosaic_0001>

<bundles_post_ra>
// kernel: tpu_custom_call.1
= control target key start
LH: loop header
LB: loop body
LE: loop exit
PB: predicated region body
PF: predicated region fallthrough
CT: control target
= control target key end

     0   :  { %10 = vsyncpa [#allocation3], 0  ;;  %s1269_s0 = inlined_call_operand.hbm [shape: f32[16,128], index: 0, kind: input, shape index: {}]   ;;  %s1270_s1 = inlined_call_operand.hbm [shape: f32[128,128], index: 1, kind: input, shape index: {}]   ;;  %s1271_s2 = inlined_call_operand.vmem [shape: f32[1,128], index: 2, kind: input, shape index: {}]   ;;  %s1272_s3 = inlined_call_operand.hbm [shape: f32[128,128], index: 3, kind: input, shape index: {}]   ;;  %s1273_s4 = inlined_call_operand.vmem [shape: f32[1,128], index: 4, kind: input, shape index: {}]   ;;  %s1274_s5 = inlined_call_operand.hbm [shape: f32[16,128], index: 5, kind: output, shape index: {}]  }
   0x1   :  { %12 = vsyncpa [#allocation3 + $0x1], 0 }
   0x2   :  { %13 = vsyncpa [#allocation6], 0 }
   0x3   :  { %14 = vsyncpa [#allocation4], 0 }
   0x4   :  { %16 = vsyncpa [#allocation4 + $0x1], 0  ;;  %s1011_s18 = smov 0   ;;  %s1013_s19 = smov 0  }
   0x5   :  { %s1015_s20 = smov 0   ;;  %s1017_s21 = smov 0  }
   0x6 LB: > { %s1032_s22 = sadd.s32 4294967295, %s970_s21   ;;  %s567_s23 = sadd.s32 4294967294, %s970_s21   ;;  %s970_s21 = sphi %s1017_s21, %s1294_s21   ;;  %s966_s20 = sphi %s1015_s20, %s1293_s20   ;;  %s962_s19 = sphi %s1013_s19, %s1292_s19   ;;  %s958_s18 = sphi %s1011_s18, %s1291_s18  }
   0x7   : > { %p42_p0 = scmp.ne.s32.totalorder %s962_s19, %s958_s18  ;;  %p1275_p1 = scmp.eq.s32.totalorder %s1032_s22, 0 }
   0x8   : > { %p156_p3 = scmp.eq.s32.totalorder %s567_s23, 1  ;;  %p568_p5 = scmp.ge.s32.totalorder %s970_s21, 1 }
   0x9   : > { %p1041_p4 = por %p1275_p1, %p42_p0  ;;  %p163_p7 = scmp.lt.s32.totalorder %s970_s21, 3 }
   0xa   : > { %p1046_p6 = por %p156_p3, %p42_p0  ;;  %s972_s27 = smov [#allocation5]  }
   0xb   : > { %s1278_s24 = scalar_select %p1041_p4, 1, 0 }
   0xc   : > { %s1279_s25 = scalar_select %p1046_p6, 1, 0 }
   0xd   : > { %p1051_p8 = pnand %p568_p5, %p163_p7  ;;  %s175_s28 = sshll.u32 %s972_s27, 4  ;;  %s1055_s28 = int_to_ptr.vmem [resolvable:$true] %s175_s28 }
   0xe   : > { %s973_s30 = smov [#allocation7]   ;;  %s814_s9 = scalar_lea.hbm %s1270_s1, 2048 }
   0xf   : > { %p750_p9 = pneg %p1051_p8  ;;  %s191_s6 = sshll.u32 %s973_s30, 4  ;;  %s1066_s6 = int_to_ptr.vmem [resolvable:$true] %s191_s6 }
  0x10   : > { %p815_p12 = scmp.ne.s32.totalorder %s1270_s1, %s814_s9  ;;  %p821_p5 = scmp.lt.u32.totalorder %s814_s9, %s1270_s1 }
  0x11   : > { %p1062_p11 = pnand %p750_p9, %p1275_p1 }
  0x13   : > { %p816_p13 = pneg %p1062_p11 }
  0x15   : > { %p817_p0 = pnand %p816_p13, %p815_p12 }
  0x17   : > { %p818_p3 = pneg %p817_p0 }
  0x19   : > { %p823_p7 = pnand %p821_p5, %p818_p3 }
  0x1b   : > { %826 = shalt.err (!%p823_p7)
}
  0x1c   : > { %s827_s14 = scalar_lea.vmem %s1055_s28, 2048  ;;  %p835_p2 = scmp.lt.s32.totalorder %s1055_s28, %s1055_s28 }
  0x1d   : > { %p828_p9 = scmp.ne.s32.totalorder %s1055_s28, %s827_s14  ;;  %p836_p12 = scmp.lt.s32.totalorder %s827_s14, %s827_s14 }
  0x1f   : > { %p830_p10 = pnand %p828_p9, %p816_p13  ;;  %p837_p0 = por %p836_p12, %p835_p2 }
  0x21   : > { %p831_p1 = pneg %p830_p10 }
  0x23   : > { %p838_p6 = pnand %p837_p0, %p831_p1 }
  0x25   : > { %841 = shalt.err (!%p838_p6)
}
  0x26   : > { %s974_s15 = smov 128   ;;  %s975_s16 = smov 8  }
  0x27   : > { %753 = dma.hbm_to_vmem [thread:$0]  (!%p1062_p11), %s1270_s1, 2048, %s1055_s28, [#allocation6], %s974_s15, %s974_s15, %s975_s16  }
  0x28   : > { %s842_s7 = scalar_lea.hbm %s1272_s3, 2048 }
  0x29   : > { %p843_p2 = scmp.ne.s32.totalorder %s1272_s3, %s842_s7  ;;  %p849_p10 = scmp.lt.u32.totalorder %s842_s7, %s1272_s3 }
  0x2b   : > { %p845_p1 = pnand %p843_p2, %p816_p13 }
  0x2d   : > { %p846_p6 = pneg %p845_p1 }
  0x2f   : > { %p851_p3 = pnand %p849_p10, %p846_p6 }
  0x31   : > { %854 = shalt.err (!%p851_p3)
}
  0x32   : > { %s855_s28 = scalar_lea.vmem %s1066_s6, 2048  ;;  %p863_p12 = scmp.lt.s32.totalorder %s1066_s6, %s1066_s6 }
  0x33   : > { %p856_p5 = scmp.ne.s32.totalorder %s1066_s6, %s855_s28  ;;  %p864_p0 = scmp.lt.s32.totalorder %s855_s28, %s855_s28 }
  0x35   : > { %p858_p7 = pnand %p856_p5, %p816_p13  ;;  %p865_p2 = por %p864_p0, %p863_p12 }
  0x37   : > { %p859_p9 = pneg %p858_p7 }
  0x39   : > { %p866_p1 = pnand %p865_p2, %p859_p9 }
  0x3b   : > { %869 = shalt.err (!%p866_p1)
}
  0x3c   : > { %756 = dma.hbm_to_vmem [thread:$0]  (!%p1062_p11), %s1272_s3, 2048, %s1066_s6, [#allocation6], %s974_s15, %s974_s15, %s975_s16  }
  0x3d   : > { %s1121_s14 = sadd.s32 1, %s970_s21   ;;  %s29_s29 = sadd.s32 1, %s966_s20 }
  0x3e   : > { %s26_s17 = ssub.s32 %s970_s21, %s1121_s14  ;;  %p36_p13 = scmp.ne.s32.totalorder %s966_s20, %s962_s19 }
  0x3f   : > { %p27_p6 = scmp.eq.s32.totalorder %s26_s17, 0  ;;  %p37_p10 = scmp.eq.s32.totalorder %s970_s21, 0 }
  0x40   : > { %p1282_p3 = scmp.eq.s32.totalorder %s1032_s22, 1  ;;  %p767_p7 = scmp.lt.s32.totalorder %s970_s21, 2 }
  0x41   : > { %s1137_s27 = scalar_select %p27_p6, %s966_s20, %s29_s29  }
  0x42   : > { %p1131_p5 = por %p1282_p3, %p36_p13  ;;  %p38_p9 = por %p37_p10, %p36_p13 }
  0x43   : > { %s208_s30 = sand.u32 1, %s966_s20   ;;  %s573_s6 = sshll.u32 %s970_s21, 7 }
  0x44   : > { %s1283_s23 = scalar_select %p1131_p5, 1, 0 }
  0x45   : > { %s572_s7 = sshll.u32 %s208_s30, 3  ;;  %s1144_s8 = scalar_lea.hbm %s1269_s0, %s573_s6 }
  0x46   : > { %s212_s9 = scalar_lea.vmem [#allocation2], %s572_s7  ;;  %p1148_p11 = pnand %p767_p7, %p38_p9 }
  0x47   : > { %s219_s10 = sshll.u32 %s212_s9, 4  ;;  %s209_s28 = scalar_lea.sflag [#allocation3], %s208_s30  ;;  %s1146_s10 = int_to_ptr.vmem [resolvable:$true] %s219_s10 }
  0x48   : > { %s870_s12 = scalar_lea.hbm %s1144_s8, 128  ;;  %p872_p0 = pneg %p1148_p11 }
  0x49   : > { %p871_p12 = scmp.ne.s32.totalorder %s1144_s8, %s870_s12  ;;  %s875_s17 = scalar_lea.hbm %s1269_s0, 256 }
  0x4a   : > { %p876_p13 = scmp.lt.u32.totalorder %s1144_s8, %s1269_s0  ;;  %p877_p6 = scmp.lt.u32.totalorder %s875_s17, %s870_s12 }
  0x4b   : > { %p873_p2 = pnand %p872_p0, %p871_p12  ;;  %p879_p3 = scmp.lt.u32.totalorder %s870_s12, %s1144_s8 }
  0x4c   : > { %p878_p10 = por %p877_p6, %p876_p13 }
  0x4d   : > { %p874_p1 = pneg %p873_p2 }
  0x4e   : > { %p880_p7 = por %p879_p3, %p878_p10 }
  0x50   : > { %p881_p9 = pnand %p880_p7, %p874_p1 }
  0x52   : > { %884 = shalt.err (!%p881_p9)
}
  0x53   : > { %s885_s30 = scalar_lea.vmem %s1146_s10, 128  ;;  %s976_s15 = smov [#allocation2]  }
  0x54   : > { %p886_p12 = scmp.ne.s32.totalorder %s1146_s10, %s885_s30  ;;  %s890_s16 = sshll.u32 %s976_s15, 4  ;;  %s891_s16 = int_to_ptr.vmem [resolvable:$false] %s890_s16 }
  0x55   : > { %s892_s9 = scalar_lea.vmem %s891_s16, 256  ;;  %p893_p4 = scmp.lt.s32.totalorder %s1146_s10, %s891_s16 }
  0x56   : > { %p888_p2 = pnand %p886_p12, %p872_p0  ;;  %p894_p13 = scmp.lt.s32.totalorder %s892_s9, %s885_s30 }
  0x58   : > { %p889_p5 = pneg %p888_p2  ;;  %p895_p6 = por %p894_p13, %p893_p4 }
  0x5a   : > { %p896_p10 = pnand %p895_p6, %p889_p5 }
  0x5c   : > { %899 = shalt.err (!%p896_p10)
}
  0x5d   : > { %760 = dma.hbm_to_vmem [thread:$0]  (!%p1148_p11), %s1144_s8, 128, %s1146_s10, %s209_s28  }
  0x5e   : > { %228 = sbr.rel (%p1051_p8) target bundleno = 609 (0x261), region = 40  ;;  %s1180_s12 = sand.u32 (!%p1051_p8), 1, %s962_s19  }
  0x5f   : > { %s575_s13 = sshll.u32 (!%p1051_p8), %s1180_s12, 3  ;;  %s231_s29 = scalar_lea.sflag (!%p1051_p8), [#allocation3], %s1180_s12 }
  0x60   : > { %s1186_s17 = scalar_lea.vmem (!%p1051_p8), [#allocation2], %s575_s13  ;;  %p1285_p4 = scmp.ne.s32.totalorder (!%p1051_p8), %s1278_s24, 0 }
  0x65   : > { %945 = dma.done.wait (%p1285_p4), %s231_s29, 128  }
  0x66   : > { %947 = vsyncadd (%p1285_p4), %s231_s29, 4294967168  ;;  %p1286_p5 = scmp.eq.s32.totalorder %s1032_s22, 0 }
  0x68   : > { %949 = dma.done.wait (%p1286_p5), [#allocation6], 4096   ;;  %p1287_p8 = pmov %p1286_p5 }
  0x69   : > { %v977_v0 = vmov 0.0|0.0   ;;  %vm978_vm0 = vmmov 0   ;;  %v979_v1 = vmov 0.0   ;;  %v270_v2 = vld [vmem:[#allocation5] sm:$0xff]  ;;  %v271_v3 = vld [vmem:[#allocation5 + $0x8] sm:$0xff]  ;;  %v272_v4 = vld [vmem:[#allocation5 + $0x10] sm:$0xff] }
  0x6a   : > { %951 = vsyncadd (%p1287_p8), [#allocation6], 4294963200  ;;  %690 = vmatprep.subr.bf16.mxu0 %v977_v0  ;;  %652 = vmatprep.mubr.msk.f32.mxu0 %vm978_vm0, %v979_v1  ;;  %v691_v5 = vpack.c.bf16 %v271_v3, %v270_v2  ;;  %v273_v6 = vld [vmem:[#allocation5 + $0x18] sm:$0xff]  ;;  %v274_v8 = vld [vmem:[#allocation5 + $0x20] sm:$0xff]  ;;  %s583_s11 = sshll.u32 %s1032_s22, 7  ;;  %s268_s28 = scalar_lea.vmem [#allocation8], %s575_s13 }
  0x6b   : > { %714 = vmatprep.subr.bf16.mxu1 %v977_v0  ;;  %687 = vmatprep.mubr.msk.f32.mxu1 %vm978_vm0, %v979_v1  ;;  %v694_v7 = vpack.c.bf16 %v273_v6, %v272_v4  ;;  %v275_v9 = vld [vmem:[#allocation5 + $0x28] sm:$0xff]  ;;  %v276_v11 = vld [vmem:[#allocation5 + $0x30] sm:$0xff]  ;;  %v277_v12 = vld [vmem:[#allocation5 + $0x38] sm:$0xff]  ;;  %s478_s7 = sshll.u32 %s268_s28, 4  ;;  %s1225_s15 = scalar_lea.hbm %s1274_s5, %s583_s11  ;;  %s1227_s7 = int_to_ptr.vmem [resolvable:$true] %s478_s7 }
  0x6c   : > { %692 = vmatpush3.bf16.msra.mxu0 %v691_v5  ;;  %v697_v10 = vpack.c.bf16 %v275_v9, %v274_v8  ;;  %v700_v13 = vpack.c.bf16 %v277_v12, %v276_v11  ;;  %v278_v14 = vld [vmem:[#allocation5 + $0x40] sm:$0xff]  ;;  %v279_v15 = vld [vmem:[#allocation5 + $0x48] sm:$0xff]  ;;  %v280_v17 = vld [vmem:[#allocation5 + $0x50] sm:$0xff]  ;;  %s465_s16 = scalar_lea.sflag [#allocation4], %s1180_s12  ;;  %s900_s9 = scalar_lea.vmem %s1227_s7, 128 }
  0x6d   : > { %693 = vmatprep.subr.bf16.mxu0 %v977_v0  ;;  %v703_v16 = vpack.c.bf16 %v279_v15, %v278_v14  ;;  %v281_v18 = vld [vmem:[#allocation5 + $0x58] sm:$0xff]  ;;  %v282_v20 = vld [vmem:[#allocation5 + $0x60] sm:$0xff]  ;;  %v283_v21 = vld [vmem:[#allocation5 + $0x68] sm:$0xff]  ;;  %p901_p11 = scmp.ne.s32.totalorder %s1227_s7, %s900_s9  ;;  %p1288_p0 = scmp.ne.s32.totalorder %s1283_s23, 0 }
  0x6e   : > { %v706_v19 = vpack.c.bf16 %v281_v18, %v280_v17  ;;  %v709_v22 = vpack.c.bf16 %v283_v21, %v282_v20  ;;  %v284_v23 = vld [vmem:[#allocation5 + $0x70] sm:$0xff]  ;;  %v285_v24 = vld [vmem:[#allocation5 + $0x78] sm:$0xff]  ;;  %v370_v27 = vld [vmem:[#allocation7] sm:$0xff]  ;;  %s980_s22 = smov [#allocation8]  }
  0x6f   : > { %v712_v25 = vpack.c.bf16 %v285_v24, %v284_v23  ;;  %v269_v26 = vld [vmem:[%s1186_s17] sm:$0xff]  ;;  %v371_v28 = vld [vmem:[#allocation7 + $0x8] sm:$0xff]  ;;  %v374_v33 = vld [vmem:[#allocation7 + $0x20] sm:$0xff]  ;;  %p902_p1 = pnand %p901_p11, %p1288_p0  ;;  %s904_s13 = sshll.u32 %s980_s22, 4  ;;  %s905_s13 = int_to_ptr.vmem [resolvable:$false] %s904_s13 }
  0x70   : > { %695 = vmatpush3.bf16.msra.mxu0 %v694_v7  ;;  %v715_v29 = vpack.c.bf16 %v371_v28, %v370_v27  ;;  %v372_v30 = vld [vmem:[#allocation7 + $0x10] sm:$0xff]  ;;  %v373_v31 = vld [vmem:[#allocation7 + $0x18] sm:$0xff]  ;;  %v375_v34 = vld [vmem:[#allocation7 + $0x28] sm:$0xff]  ;;  %s906_s29 = scalar_lea.vmem %s905_s13, 256  ;;  %p907_p7 = scmp.lt.s32.totalorder %s1227_s7, %s905_s13 }
  0x71   : > { %696 = vmatprep.subr.bf16.mxu0 %v977_v0  ;;  %v718_v32 = vpack.c.bf16 %v373_v31, %v372_v30  ;;  %v721_v35 = vpack.c.bf16 %v375_v34, %v374_v33  ;;  %v376_v36 = vld [vmem:[#allocation7 + $0x30] sm:$0xff]  ;;  %v377_v37 = vld [vmem:[#allocation7 + $0x38] sm:$0xff]  ;;  %v378_v39 = vld [vmem:[#allocation7 + $0x40] sm:$0xff]  ;;  %p903_p3 = pneg %p902_p1  ;;  %p908_p9 = scmp.lt.s32.totalorder %s906_s29, %s900_s9 }
  0x72   : > { %716 = vmatpush3.bf16.msra.mxu1 %v715_v29  ;;  %v724_v38 = vpack.c.bf16 %v377_v37, %v376_v36  ;;  %v379_v40 = vld [vmem:[#allocation7 + $0x48] sm:$0xff]  ;;  %v380_v42 = vld [vmem:[#allocation7 + $0x50] sm:$0xff]  ;;  %v381_v43 = vld [vmem:[#allocation7 + $0x58] sm:$0xff] }
  0x73   : > { %717 = vmatprep.subr.bf16.mxu1 %v977_v0  ;;  %v727_v41 = vpack.c.bf16 %v379_v40, %v378_v39  ;;  %v730_v44 = vpack.c.bf16 %v381_v43, %v380_v42  ;;  %v382_v45 = vld [vmem:[#allocation7 + $0x60] sm:$0xff]  ;;  %v383_v46 = vld [vmem:[#allocation7 + $0x68] sm:$0xff]  ;;  %v384_v48 = vld [vmem:[#allocation7 + $0x70] sm:$0xff]  ;;  %p909_p12 = por %p908_p9, %p907_p7 }
  0x74   : > { %698 = vmatpush3.bf16.msra.mxu0 %v697_v10  ;;  %v733_v47 = vpack.c.bf16 %v383_v46, %v382_v45  ;;  %v385_v49 = vld [vmem:[#allocation7 + $0x78] sm:$0xff]  ;;  %v579_v51 = vld [vmem:[%s1271_s2] ss:$0 sm:$0xff] }
  0x75   : > { %699 = vmatprep.subr.bf16.mxu0 %v977_v0  ;;  %v736_v50 = vpack.c.bf16 %v385_v49, %v384_v48  ;;  %v581_v60 = vld [vmem:[%s1273_s4] ss:$0 sm:$0xff]  ;;  %p910_p2 = pnand %p909_p12, %p903_p3 }
  0x76   : > { %719 = vmatpush3.bf16.msra.mxu1 %v718_v32 }
  0x77   : > { %720 = vmatprep.subr.bf16.mxu1 %v977_v0 }
  0x78   : > { %701 = vmatpush3.bf16.msra.mxu0 %v700_v13 }
  0x79   : > { %702 = vmatprep.subr.bf16.mxu0 %v977_v0 }
  0x7a   : > { %722 = vmatpush3.bf16.msra.mxu1 %v721_v35 }
  0x7b   : > { %723 = vmatprep.subr.bf16.mxu1 %v977_v0 }
  0x7c   : > { %704 = vmatpush3.bf16.msra.mxu0 %v703_v16 }
  0x7d   : > { %705 = vmatprep.subr.bf16.mxu0 %v977_v0 }
  0x7e   : > { %725 = vmatpush3.bf16.msra.mxu1 %v724_v38 }
  0x7f   : > { %726 = vmatprep.subr.bf16.mxu1 %v977_v0 }
  0x80   : > { %707 = vmatpush3.bf16.msra.mxu0 %v706_v19 }
  0x81   : > { %708 = vmatprep.subr.bf16.mxu0 %v977_v0 }
  0x82   : > { %728 = vmatpush3.bf16.msra.mxu1 %v727_v41 }
  0x83   : > { %729 = vmatprep.subr.bf16.mxu1 %v977_v0 }
  0x84   : > { %710 = vmatpush3.bf16.msra.mxu0 %v709_v22 }
  0x85   : > { %711 = vmatprep.subr.bf16.mxu0 %v977_v0 }
  0x86   : > { %731 = vmatpush3.bf16.msra.mxu1 %v730_v44 }
  0x87   : > { %732 = vmatprep.subr.bf16.mxu1 %v977_v0 }
  0x88   : > { %713 = vmatpush3.bf16.msra.mxu0 %v712_v25 }
  0x8a   : > { %734 = vmatpush3.bf16.msra.mxu1 %v733_v47 }
  0x8b   : > { %653 = vmatmul.mubr.f32.vlgmr.msra.gmra.mrb[0].mxu0 %v269_v26  ;;  %735 = vmatprep.subr.bf16.mxu1 %v977_v0 }
  0x8e   : > { %737 = vmatpush3.bf16.msra.mxu1 %v736_v50 }
 0x15e   : > { %v359_v52 = vpop.f32.mrb[0].mxu0 }
 0x15f   : > { %v360_v53 = vadd.f32 %v579_v51, %v359_v52  ;;  %v654_v54 = vpop.f32.mrb[1].mxu0 }
 0x161   : > { %v580_v55 = vmul.f32 -1.442695, %v360_v53 }
 0x163   : > { %810 = vpow2.f32 %v580_v55 }
 0x16d   : > { %v811_v56 = vpop.eup %810 }
 0x16e   : > { %v366_v57 = vadd.f32 1.0, %v811_v56 }
 0x170   : > { %812 = vrcp.f32 %v366_v57 }
 0x17a   : > { %v813_v58 = vpop.eup %812 }
 0x17b   : > { %v369_v59 = vmul.f32 %v813_v58, %v360_v53 }
 0x17d   : > { %688 = vmatmul.mubr.f32.vlgmr.msra.gmra.mrb[0].mxu1 %v369_v59 }
 0x250   : > { %v459_v61 = vpop.f32.mrb[0].mxu1 }
 0x251   : > { %v460_v62 = vadd.f32 %v581_v60, %v459_v61  ;;  %v689_v63 = vpop.f32.mrb[1].mxu1 }
 0x253   : > { %463 = vst [vmem:[%s268_s28] sm:$0xff] %v460_v62 }
 0x254   : > { %913 = shalt.err (!%p910_p2)
}
 0x255   : > { %s914_s12 = scalar_lea.hbm %s1225_s15, 128  ;;  %s918_s26 = scalar_lea.hbm %s1274_s5, 256 }
 0x256   : > { %p915_p13 = scmp.ne.s32.totalorder %s1225_s15, %s914_s12  ;;  %p919_p4 = scmp.lt.u32.totalorder %s1225_s15, %s1274_s5 }
 0x257   : > { %p920_p5 = scmp.lt.u32.totalorder %s918_s26, %s914_s12  ;;  %p922_p11 = scmp.lt.u32.totalorder %s914_s12, %s1225_s15 }
 0x258   : > { %p916_p6 = pnand %p915_p13, %p1288_p0 }
 0x259   : > { %p921_p8 = por %p920_p5, %p919_p4 }
 0x25a   : > { %p917_p10 = pneg %p916_p6 }
 0x25b   : > { %p923_p1 = por %p922_p11, %p921_p8 }
 0x25d   : > { %p924_p3 = pnand %p923_p1, %p917_p10 }
 0x25f   : > { %927 = shalt.err (!%p924_p3)
}
 0x260   : > { %748 = dma.vmem_to_hbm [thread:$0]  (%p1288_p0), %s1227_s7, 128, %s1225_s15, %s465_s16  }
 0x261 PF: > { %s490_s11 = sand.u32 1, %s958_s18   ;;  %p1289_p7 = scmp.ne.s32.totalorder %s1279_s25, 0 }
 0x262   : > { %p1290_p9 = scmp.ge.s32.totalorder %s970_s21, 2  ;;  %s491_s28 = scalar_lea.sflag [#allocation4], %s490_s11 }
 0x264   : > { %p762_p12 = pnand %p1290_p9, %p1289_p7 }
 0x266   : > { %953 = dma.done.wait (!%p762_p12), %s491_s28, 128  }
 0x267   : > { %955 = vsyncadd (!%p762_p12), %s491_s28, 4294967168  ;;  %p19_p2 = scmp.ge.s32.totalorder %s1121_s14, 4   ;;  %s1291_s18 = smov %s962_s19 }
 0x268   : > { %s1292_s19 = smov %s966_s20  ;;  %s1293_s20 = smov %s1137_s27 }
 0x269   : > { %s1294_s21 = smov %s1121_s14  ;;  %21 = sbr.rel (!%p19_p2) target bundleno = 6 (0x6), region = 93 }
 0x270   :  { %496 = vsyncpa [#allocation3], 1 }
 0x271   :  { %498 = vsyncpa [#allocation3 + $0x1], 1 }
 0x272   :  { %499 = vsyncpa [#allocation6], 1 }
 0x273   :  { %500 = vsyncpa [#allocation4], 1 }
 0x274   :  { %502 = vsyncpa [#allocation4 + $0x1], 1 }

</bundles_post_ra>
